<compile_context>
chip_gen: v5e
topology: v5e:2x2
jax: 0.10.0
libtpu: 0.0.40
codegen_flags: <defaults>
</compile_context>

<pallas_src>
import functools

import jax
import jax.numpy as jnp
from jax.experimental import pallas as pl
from jax.experimental.pallas import tpu as pltpu

LANE = 128  # lane width: classifier output dim padded to a multiple of this


def _round_up(v, m):
    return ((v + m - 1) // m) * m


def _vmem_capacity_bytes():
    try:
        return int(pltpu.get_tpu_info().vmem_capacity_bytes)
    except Exception:
        return 64 * 1024 * 1024  # conservative (v7x per-TC figure)


def mean_mil_kernel(x_ref, w1_ref, b1_ref, w2_ref, b2_ref, pool_ref,
                    inst_ref, out_ref, *, inv_bag_size):
    # x_ref: (TM, H) -- TM = bags_per_tile * bag_size flattened instances.
    x = x_ref[...]
    w1 = w1_ref[...]

    # post_encoder: Linear(H, H) + ReLU (f32 accumulation on the MXU).
    h = jnp.dot(x, w1, preferred_element_type=jnp.float32)            # (TM, H) f32
    h = jnp.maximum(h + b1_ref[...].astype(jnp.float32), 0.0)

    w2 = w2_ref[...]                                                   # (H, C_pad)
    b2 = b2_ref[...].astype(jnp.float32)                              # (1, C_pad)
    h_c = h.astype(w2.dtype)

    # classifier: per-instance logits, lane-dense (TM, C_pad) store.
    logits = jnp.dot(h_c, w2, preferred_element_type=jnp.float32) + b2
    inst_ref[...] = logits.astype(inst_ref.dtype)

    # attention is None -> bag output is the mean over the bag dimension.
    # Bag sum via an MXU matmul with a 0/1 bag-membership matrix (no XLU
    # reduction, no in-kernel reshape), then linearity:
    #   mean_bag(h @ W2 + b2) == mean_bag(h) @ W2 + b2.
    h_bag_sum = jnp.dot(pool_ref[...], h_c,
                        preferred_element_type=jnp.float32)            # (bags, H) f32
    h_bag_mean = (h_bag_sum * inv_bag_size).astype(w2.dtype)
    pooled = jnp.dot(h_bag_mean, w2, preferred_element_type=jnp.float32) + b2
    out_ref[...] = pooled.astype(out_ref.dtype)


def mean_mil_forward(x, w1, b1, w2, b2, *, compute_dtype=None, tm_target=1024):
    """MeanMIL forward. x: (B, N, H); weights stored as (in, out) so y = x @ W + b."""
    B, N, H = x.shape
    C = w2.shape[1]
    out_dtype = x.dtype

    cdtype = jnp.dtype(compute_dtype) if compute_dtype is not None else jnp.dtype(x.dtype)
    sub = 16 if cdtype.itemsize == 2 else 8        # sublane granule: (8,128) f32 / (16,128) bf16

    # ---- Lane-dense classifier width ----
    C_pad = max(LANE, _round_up(C, LANE))

    # ---- Tile selection: bag-aligned, sublane-aligned, VMEM-budget aware ----
    vmem_cap = _vmem_capacity_bytes()
    x_bytes = cdtype.itemsize
    o_bytes = jnp.dtype(out_dtype).itemsize

    bags_target = max(1, tm_target // max(N, 1))
    bags = _round_up(min(bags_target, B), sub)
    if B > 2 * sub:                                # keep >= ~4 grid steps so both v7x TCs get work
        bags = min(bags, _round_up(pl.cdiv(B, 4), sub))
    bags = max(bags, sub)

    def _tile_bytes(bg):
        tm = bg * N
        return (2 * tm * H * x_bytes                        # x tile, double-buffered
                + 2 * tm * C_pad * o_bytes                  # per-instance logits tile
                + 2 * bg * C_pad * o_bytes                  # pooled tile
                + (H * H + H * C_pad + bg * tm) * x_bytes   # single-buffered weights + pool matrix
                + (H + C_pad) * 4)                          # f32 biases

    budget = int(0.6 * vmem_cap)
    while bags > sub and _tile_bytes(bags) > budget:
        bags -= sub

    TM = bags * N
    B_pad = _round_up(B, bags)
    rows, rows_pad = B * N, B_pad * N
    num_tiles = B_pad // bags
    vmem_limit = int(min(0.9 * vmem_cap, max(32 * 1024 * 1024, 2 * _tile_bytes(bags))))

    # ---- Operand preparation (wrapper-side, cheap XLA ops) ----
    x_flat = x.reshape(rows, H).astype(cdtype)
    if rows_pad > rows:
        x_flat = jnp.pad(x_flat, ((0, rows_pad - rows), (0, 0)))
    w1c = w1.astype(cdtype)
    w2p = jnp.pad(w2.astype(cdtype), ((0, 0), (0, C_pad - C)))
    b1f = b1.astype(jnp.float32)
    b2p = jnp.pad(b2.astype(jnp.float32), ((0, 0), (0, C_pad - C)))
    # 0/1 bag-membership matrix: the per-bag mean becomes an MXU matmul.
    bag_of_row = jnp.repeat(jnp.arange(bags), N)                         # (TM,)
    pool = (jnp.arange(bags)[:, None] == bag_of_row[None, :]).astype(cdtype)  # (bags, TM)

    kernel = functools.partial(mean_mil_kernel, inv_bag_size=1.0 / N)

    cost = pl.CostEstimate(
        flops=int(2 * rows_pad * H * (H + C_pad) + 2 * B_pad * TM * H + 2 * B_pad * H * C_pad),
        transcendentals=0,
        bytes_accessed=int(rows_pad * H * x_bytes
                           + (H * H + H * C_pad + bags * TM) * x_bytes + (H + C_pad) * 4
                           + rows_pad * C_pad * o_bytes + B_pad * C_pad * o_bytes),
    )

    def build(single_buffer_weights):
        inv = dict(pipeline_mode=pl.Buffered(1)) if single_buffer_weights else {}
        return pl.pallas_call(
            kernel,
            out_shape=(
                jax.ShapeDtypeStruct((rows_pad, C_pad), out_dtype),   # per-instance logits (flat, padded)
                jax.ShapeDtypeStruct((B_pad, C_pad), out_dtype),      # pooled bag output (padded)
            ),
            grid_spec=pltpu.PrefetchScalarGridSpec(
                num_scalar_prefetch=0,
                grid=(num_tiles,),
                in_specs=[
                    pl.BlockSpec((TM, H), lambda i: (i, 0)),                 # x row tile (bag-aligned)
                    pl.BlockSpec((H, H), lambda i: (0, 0), **inv),           # w1 (grid-invariant)
                    pl.BlockSpec((1, H), lambda i: (0, 0), **inv),           # b1
                    pl.BlockSpec((H, C_pad), lambda i: (0, 0), **inv),       # w2 (lane-padded)
                    pl.BlockSpec((1, C_pad), lambda i: (0, 0), **inv),       # b2
                    pl.BlockSpec((bags, TM), lambda i: (0, 0), **inv),       # bag-membership matrix
                ],
                out_specs=[
                    pl.BlockSpec((TM, C_pad), lambda i: (i, 0)),             # per-instance logits
                    pl.BlockSpec((bags, C_pad), lambda i: (i, 0)),           # pooled output
                ],
            ),
            compiler_params=pltpu.CompilerParams(
                dimension_semantics=("parallel",),     # row-tile axis shards across v7x TCs
                vmem_limit_bytes=vmem_limit,
            ),
            cost_estimate=cost,
        )

    args = (x_flat, w1c, b1f, w2p, b2p, pool)
    try:
        inst_flat, pooled = build(True)(*args)
    except Exception:
        # TODO(synk): pipeline_mode=pl.Buffered(1) unsupported on this jax build;
        # fall back to default double-buffered specs for the invariant operands.
        inst_flat, pooled = build(False)(*args)

    out_per_instance = inst_flat[:rows, :C].reshape(B, N, C)
    out = pooled[:B, :C]

    # attention is None for this instantiation (PyTorch default branch).
    return {
        "out": out,
        "meta": {"out_per_instance": out_per_instance, "attention_weights": None},
    }


def _reference(x, w1, b1, w2, b2):
    h = jnp.maximum(jnp.einsum("bnh,hk->bnk", x, w1) + b1, 0.0)
    logits = jnp.einsum("bnh,hc->bnc", h, w2) + b2
    return logits, logits.mean(axis=1)


if __name__ == "__main__":
    key = jax.random.PRNGKey(0)
    kx, kw1, kb1, kw2, kb2 = jax.random.split(key, 5)

    # Small shapes consistent with (batch, bag_size, hidden_dimension).
    B, N, H, C = 2, 8, 32, 4
    x = jax.random.normal(kx, (B, N, H), dtype=jnp.float32)
    # Deterministic synthetic parameters, stored as (in, out) for y = x @ W + b.
    w1 = jax.random.normal(kw1, (H, H), dtype=jnp.float32) * (1.0 / jnp.sqrt(H))
    b1 = jax.random.normal(kb1, (1, H), dtype=jnp.float32) * 0.01
    w2 = jax.random.normal(kw2, (H, C), dtype=jnp.float32) * (1.0 / jnp.sqrt(H))
    b2 = jax.random.normal(kb2, (1, C), dtype=jnp.float32) * 0.01

    # --- Case 1: f32, tight tolerance ---
    res = mean_mil_forward(x, w1, b1, w2, b2)
    jax.block_until_ready(res["out"])
    jax.block_until_ready(res["meta"]["out_per_instance"])
    ref_inst, ref_out = _reference(x, w1, b1, w2, b2)
    assert jnp.allclose(res["meta"]["out_per_instance"], ref_inst, atol=1e-4, rtol=1e-4)
    assert jnp.allclose(res["out"], ref_out, atol=1e-4, rtol=1e-4)
    assert res["meta"]["attention_weights"] is None

    # --- Case 2: awkward (B, N) exercising bag/row padding + output slicing ---
    B2, N2 = 3, 5
    x2 = jax.random.normal(kx, (B2, N2, H), dtype=jnp.float32)
    res2 = mean_mil_forward(x2, w1, b1, w2, b2)
    jax.block_until_ready(res2["out"])
    ref_inst2, ref_out2 = _reference(x2, w1, b1, w2, b2)
    assert jnp.allclose(res2["meta"]["out_per_instance"], ref_inst2, atol=1e-4, rtol=1e-4)
    assert jnp.allclose(res2["out"], ref_out2, atol=1e-4, rtol=1e-4)

    # --- Case 3: bf16 streaming operands (f32 accumulation), loose tolerance ---
    res3 = mean_mil_forward(x, w1, b1, w2, b2, compute_dtype=jnp.bfloat16)
    jax.block_until_ready(res3["out"])
    assert jnp.allclose(res3["meta"]["out_per_instance"], ref_inst, atol=2e-2, rtol=2e-2)
    assert jnp.allclose(res3["out"], ref_out, atol=2e-2, rtol=2e-2)

    print("KERNEL_OK")
</pallas_src>

<mosaic_0001>
module attributes {stable_mosaic.version = 11 : i64} {
  func.func @mean_mil_kernel(%arg0: i32, %arg1: memref<64x32xf32, #tpu.memory_space<vmem>>, %arg2: memref<32x32xf32, #tpu.memory_space<vmem>>, %arg3: memref<1x32xf32, #tpu.memory_space<vmem>>, %arg4: memref<32x128xf32, #tpu.memory_space<vmem>>, %arg5: memref<1x128xf32, #tpu.memory_space<vmem>>, %arg6: memref<8x64xf32, #tpu.memory_space<vmem>>, %arg7: memref<64x128xf32, #tpu.memory_space<vmem>>, %arg8: memref<8x128xf32, #tpu.memory_space<vmem>>) attributes {dimension_semantics = [#tpu.dimension_semantics<parallel>], iteration_bounds = array<i64: 1>, scalar_prefetch = 0 : i64, scratch_operands = 0 : i64, tpu.core_type = #tpu.core_type<tc>, window_params = [{transform_indices = @transform_0, window_bounds = array<i64: 64, 32>}, {pipeline_mode = #tpu.pipeline_mode<synchronous>, transform_indices = @transform_1, window_bounds = array<i64: 32, 32>}, {pipeline_mode = #tpu.pipeline_mode<synchronous>, transform_indices = @transform_2, window_bounds = array<i64: 1, 32>}, {pipeline_mode = #tpu.pipeline_mode<synchronous>, transform_indices = @transform_3, window_bounds = array<i64: 32, 128>}, {pipeline_mode = #tpu.pipeline_mode<synchronous>, transform_indices = @transform_4, window_bounds = array<i64: 1, 128>}, {pipeline_mode = #tpu.pipeline_mode<synchronous>, transform_indices = @transform_5, window_bounds = array<i64: 8, 64>}, {transform_indices = @transform_6, window_bounds = array<i64: 64, 128>}, {transform_indices = @transform_7, window_bounds = array<i64: 8, 128>}]} {
    %c0 = arith.constant 0 : index
    %c0_0 = arith.constant 0 : index
    %0 = vector.load %arg1[%c0, %c0_0] : memref<64x32xf32, #tpu.memory_space<vmem>>, vector<64x32xf32>
    %c0_1 = arith.constant 0 : index
    %c0_2 = arith.constant 0 : index
    %1 = vector.load %arg2[%c0_1, %c0_2] : memref<32x32xf32, #tpu.memory_space<vmem>>, vector<32x32xf32>
    %cst = arith.constant dense<0.000000e+00> : vector<64x32xf32>
    %2 = tpu.matmul %0, %1, %cst {dimension_numbers = #tpu.dot_dimension_numbers<[1], [0], [0], [1], [0, 0, 1, 1], [], []>} : vector<64x32xf32>, vector<32x32xf32>, vector<64x32xf32> -> vector<64x32xf32>
    %c0_3 = arith.constant 0 : index
    %c0_4 = arith.constant 0 : index
    %3 = vector.load %arg3[%c0_3, %c0_4] : memref<1x32xf32, #tpu.memory_space<vmem>>, vector<1x32xf32>
    %4 = vector.broadcast %3 : vector<1x32xf32> to vector<64x32xf32>
    %5 = arith.addf %2, %4 : vector<64x32xf32>
    %cst_5 = arith.constant 0.000000e+00 : f32
    %6 = vector.broadcast %cst_5 : f32 to vector<64x32xf32>
    %7 = arith.maximumf %5, %6 : vector<64x32xf32>
    %c0_6 = arith.constant 0 : index
    %c0_7 = arith.constant 0 : index
    %8 = vector.load %arg4[%c0_6, %c0_7] : memref<32x128xf32, #tpu.memory_space<vmem>>, vector<32x128xf32>
    %c0_8 = arith.constant 0 : index
    %c0_9 = arith.constant 0 : index
    %9 = vector.load %arg5[%c0_8, %c0_9] : memref<1x128xf32, #tpu.memory_space<vmem>>, vector<1x128xf32>
    %cst_10 = arith.constant dense<0.000000e+00> : vector<64x128xf32>
    %10 = tpu.matmul %7, %8, %cst_10 {dimension_numbers = #tpu.dot_dimension_numbers<[1], [0], [0], [1], [0, 0, 1, 1], [], []>} : vector<64x32xf32>, vector<32x128xf32>, vector<64x128xf32> -> vector<64x128xf32>
    %11 = vector.broadcast %9 : vector<1x128xf32> to vector<64x128xf32>
    %12 = arith.addf %10, %11 : vector<64x128xf32>
    %c0_11 = arith.constant 0 : index
    %c0_12 = arith.constant 0 : index
    %13 = vector.load %arg7[%c0_11, %c0_12] : memref<64x128xf32, #tpu.memory_space<vmem>>, vector<64x128xf32>
    tpu.vector_store %arg7[%c0_11, %c0_12], %12 {strides = array<i32>} : memref<64x128xf32, #tpu.memory_space<vmem>>, vector<64x128xf32>,
    %c0_13 = arith.constant 0 : index
    %c0_14 = arith.constant 0 : index
    %14 = vector.load %arg6[%c0_13, %c0_14] : memref<8x64xf32, #tpu.memory_space<vmem>>, vector<8x64xf32>
    %cst_15 = arith.constant dense<0.000000e+00> : vector<8x32xf32>
    %15 = tpu.matmul %14, %7, %cst_15 {dimension_numbers = #tpu.dot_dimension_numbers<[1], [0], [0], [1], [0, 0, 1, 1], [], []>} : vector<8x64xf32>, vector<64x32xf32>, vector<8x32xf32> -> vector<8x32xf32>
    %cst_16 = arith.constant 1.250000e-01 : f32
    %16 = vector.broadcast %cst_16 : f32 to vector<8x32xf32>
    %17 = arith.mulf %15, %16 : vector<8x32xf32>
    %cst_17 = arith.constant dense<0.000000e+00> : vector<8x128xf32>
    %18 = tpu.matmul %17, %8, %cst_17 {dimension_numbers = #tpu.dot_dimension_numbers<[1], [0], [0], [1], [0, 0, 1, 1], [], []>} : vector<8x32xf32>, vector<32x128xf32>, vector<8x128xf32> -> vector<8x128xf32>
    %19 = vector.broadcast %9 : vector<1x128xf32> to vector<8x128xf32>
    %20 = arith.addf %18, %19 : vector<8x128xf32>
    %c0_18 = arith.constant 0 : index
    %c0_19 = arith.constant 0 : index
    %21 = vector.load %arg8[%c0_18, %c0_19] : memref<8x128xf32, #tpu.memory_space<vmem>>, vector<8x128xf32>
    tpu.vector_store %arg8[%c0_18, %c0_19], %20 {strides = array<i32>} : memref<8x128xf32, #tpu.memory_space<vmem>>, vector<8x128xf32>,
    return
  }
  func.func @transform_0(%arg0: i32) -> (i32, i32) {
    %c0_i32 = arith.constant 0 : i32
    %c0_i32_0 = arith.constant 0 : i32
    return %arg0, %c0_i32 : i32, i32
  }
  func.func @transform_1(%arg0: i32) -> (i32, i32) {
    %c0_i32 = arith.constant 0 : i32
    %c0_i32_0 = arith.constant 0 : i32
    %c0_i32_1 = arith.constant 0 : i32
    return %c0_i32, %c0_i32_0 : i32, i32
  }
  func.func @transform_2(%arg0: i32) -> (i32, i32) {
    %c0_i32 = arith.constant 0 : i32
    %c0_i32_0 = arith.constant 0 : i32
    %c0_i32_1 = arith.constant 0 : i32
    return %c0_i32, %c0_i32_0 : i32, i32
  }
  func.func @transform_3(%arg0: i32) -> (i32, i32) {
    %c0_i32 = arith.constant 0 : i32
    %c0_i32_0 = arith.constant 0 : i32
    %c0_i32_1 = arith.constant 0 : i32
    return %c0_i32, %c0_i32_0 : i32, i32
  }
  func.func @transform_4(%arg0: i32) -> (i32, i32) {
    %c0_i32 = arith.constant 0 : i32
    %c0_i32_0 = arith.constant 0 : i32
    %c0_i32_1 = arith.constant 0 : i32
    return %c0_i32, %c0_i32_0 : i32, i32
  }
  func.func @transform_5(%arg0: i32) -> (i32, i32) {
    %c0_i32 = arith.constant 0 : i32
    %c0_i32_0 = arith.constant 0 : i32
    %c0_i32_1 = arith.constant 0 : i32
    return %c0_i32, %c0_i32_0 : i32, i32
  }
  func.func @transform_6(%arg0: i32) -> (i32, i32) {
    %c0_i32 = arith.constant 0 : i32
    %c0_i32_0 = arith.constant 0 : i32
    return %arg0, %c0_i32 : i32, i32
  }
  func.func @transform_7(%arg0: i32) -> (i32, i32) {
    %c0_i32 = arith.constant 0 : i32
    %c0_i32_0 = arith.constant 0 : i32
    return %arg0, %c0_i32 : i32, i32
  }
}

module attributes {stable_mosaic.version = 11 : i64} {
  func.func @mean_mil_kernel(%arg0: i32, %arg1: memref<64x32xf32, #tpu.memory_space<vmem>>, %arg2: memref<32x32xf32, #tpu.memory_space<vmem>>, %arg3: memref<1x32xf32, #tpu.memory_space<vmem>>, %arg4: memref<32x128xf32, #tpu.memory_space<vmem>>, %arg5: memref<1x128xf32, #tpu.memory_space<vmem>>, %arg6: memref<8x64xf32, #tpu.memory_space<vmem>>, %arg7: memref<64x128xf32, #tpu.memory_space<vmem>>, %arg8: memref<8x128xf32, #tpu.memory_space<vmem>>) attributes {dimension_semantics = [#tpu.dimension_semantics<parallel>], iteration_bounds = array<i64: 1>, scalar_prefetch = 0 : i64, scratch_operands = 0 : i64, tpu.core_type = #tpu.core_type<tc>, window_params = [{transform_indices = @transform_0, window_bounds = array<i64: 64, 32>}, {pipeline_mode = #tpu.pipeline_mode<synchronous>, transform_indices = @transform_1, window_bounds = array<i64: 32, 32>}, {pipeline_mode = #tpu.pipeline_mode<synchronous>, transform_indices = @transform_2, window_bounds = array<i64: 1, 32>}, {pipeline_mode = #tpu.pipeline_mode<synchronous>, transform_indices = @transform_3, window_bounds = array<i64: 32, 128>}, {pipeline_mode = #tpu.pipeline_mode<synchronous>, transform_indices = @transform_4, window_bounds = array<i64: 1, 128>}, {pipeline_mode = #tpu.pipeline_mode<synchronous>, transform_indices = @transform_5, window_bounds = array<i64: 8, 64>}, {transform_indices = @transform_6, window_bounds = array<i64: 64, 128>}, {transform_indices = @transform_7, window_bounds = array<i64: 8, 128>}]} {
    %c0 = arith.constant 0 : index
    %c0_0 = arith.constant 0 : index
    %0 = vector.load %arg1[%c0, %c0_0] : memref<64x32xf32, #tpu.memory_space<vmem>>, vector<64x32xf32>
    %c0_1 = arith.constant 0 : index
    %c0_2 = arith.constant 0 : index
    %1 = vector.load %arg2[%c0_1, %c0_2] : memref<32x32xf32, #tpu.memory_space<vmem>>, vector<32x32xf32>
    %cst = arith.constant dense<0.000000e+00> : vector<64x32xf32>
    %2 = tpu.matmul %0, %1, %cst {dimension_numbers = #tpu.dot_dimension_numbers<[1], [0], [0], [1], [0, 0, 1, 1], [], []>} : vector<64x32xf32>, vector<32x32xf32>, vector<64x32xf32> -> vector<64x32xf32>
    %c0_3 = arith.constant 0 : index
    %c0_4 = arith.constant 0 : index
    %3 = vector.load %arg3[%c0_3, %c0_4] : memref<1x32xf32, #tpu.memory_space<vmem>>, vector<1x32xf32>
    %4 = vector.broadcast %3 : vector<1x32xf32> to vector<64x32xf32>
    %5 = arith.addf %2, %4 : vector<64x32xf32>
    %cst_5 = arith.constant 0.000000e+00 : f32
    %6 = vector.broadcast %cst_5 : f32 to vector<64x32xf32>
    %7 = arith.maximumf %5, %6 : vector<64x32xf32>
    %c0_6 = arith.constant 0 : index
    %c0_7 = arith.constant 0 : index
    %8 = vector.load %arg4[%c0_6, %c0_7] : memref<32x128xf32, #tpu.memory_space<vmem>>, vector<32x128xf32>
    %c0_8 = arith.constant 0 : index
    %c0_9 = arith.constant 0 : index
    %9 = vector.load %arg5[%c0_8, %c0_9] : memref<1x128xf32, #tpu.memory_space<vmem>>, vector<1x128xf32>
    %cst_10 = arith.constant dense<0.000000e+00> : vector<64x128xf32>
    %10 = tpu.matmul %7, %8, %cst_10 {dimension_numbers = #tpu.dot_dimension_numbers<[1], [0], [0], [1], [0, 0, 1, 1], [], []>} : vector<64x32xf32>, vector<32x128xf32>, vector<64x128xf32> -> vector<64x128xf32>
    %11 = vector.broadcast %9 : vector<1x128xf32> to vector<64x128xf32>
    %12 = arith.addf %10, %11 : vector<64x128xf32>
    %c0_11 = arith.constant 0 : index
    %c0_12 = arith.constant 0 : index
    %13 = vector.load %arg7[%c0_11, %c0_12] : memref<64x128xf32, #tpu.memory_space<vmem>>, vector<64x128xf32>
    tpu.vector_store %arg7[%c0_11, %c0_12], %12 {strides = array<i32>} : memref<64x128xf32, #tpu.memory_space<vmem>>, vector<64x128xf32>,
    %c0_13 = arith.constant 0 : index
    %c0_14 = arith.constant 0 : index
    %14 = vector.load %arg6[%c0_13, %c0_14] : memref<8x64xf32, #tpu.memory_space<vmem>>, vector<8x64xf32>
    %cst_15 = arith.constant dense<0.000000e+00> : vector<8x32xf32>
    %15 = tpu.matmul %14, %7, %cst_15 {dimension_numbers = #tpu.dot_dimension_numbers<[1], [0], [0], [1], [0, 0, 1, 1], [], []>} : vector<8x64xf32>, vector<64x32xf32>, vector<8x32xf32> -> vector<8x32xf32>
    %cst_16 = arith.constant 1.250000e-01 : f32
    %16 = vector.broadcast %cst_16 : f32 to vector<8x32xf32>
    %17 = arith.mulf %15, %16 : vector<8x32xf32>
    %cst_17 = arith.constant dense<0.000000e+00> : vector<8x128xf32>
    %18 = tpu.matmul %17, %8, %cst_17 {dimension_numbers = #tpu.dot_dimension_numbers<[1], [0], [0], [1], [0, 0, 1, 1], [], []>} : vector<8x32xf32>, vector<32x128xf32>, vector<8x128xf32> -> vector<8x128xf32>
    %19 = vector.broadcast %9 : vector<1x128xf32> to vector<8x128xf32>
    %20 = arith.addf %18, %19 : vector<8x128xf32>
    %c0_18 = arith.constant 0 : index
    %c0_19 = arith.constant 0 : index
    %21 = vector.load %arg8[%c0_18, %c0_19] : memref<8x128xf32, #tpu.memory_space<vmem>>, vector<8x128xf32>
    tpu.vector_store %arg8[%c0_18, %c0_19], %20 {strides = array<i32>} : memref<8x128xf32, #tpu.memory_space<vmem>>, vector<8x128xf32>,
    return
  }
  func.func @transform_0(%arg0: i32) -> (i32, i32) {
    %c0_i32 = arith.constant 0 : i32
    %c0_i32_0 = arith.constant 0 : i32
    return %arg0, %c0_i32 : i32, i32
  }
  func.func @transform_1(%arg0: i32) -> (i32, i32) {
    %c0_i32 = arith.constant 0 : i32
    %c0_i32_0 = arith.constant 0 : i32
    %c0_i32_1 = arith.constant 0 : i32
    return %c0_i32, %c0_i32_0 : i32, i32
  }
  func.func @transform_2(%arg0: i32) -> (i32, i32) {
    %c0_i32 = arith.constant 0 : i32
    %c0_i32_0 = arith.constant 0 : i32
    %c0_i32_1 = arith.constant 0 : i32
    return %c0_i32, %c0_i32_0 : i32, i32
  }
  func.func @transform_3(%arg0: i32) -> (i32, i32) {
    %c0_i32 = arith.constant 0 : i32
    %c0_i32_0 = arith.constant 0 : i32
    %c0_i32_1 = arith.constant 0 : i32
    return %c0_i32, %c0_i32_0 : i32, i32
  }
  func.func @transform_4(%arg0: i32) -> (i32, i32) {
    %c0_i32 = arith.constant 0 : i32
    %c0_i32_0 = arith.constant 0 : i32
    %c0_i32_1 = arith.constant 0 : i32
    return %c0_i32, %c0_i32_0 : i32, i32
  }
  func.func @transform_5(%arg0: i32) -> (i32, i32) {
    %c0_i32 = arith.constant 0 : i32
    %c0_i32_0 = arith.constant 0 : i32
    %c0_i32_1 = arith.constant 0 : i32
    return %c0_i32, %c0_i32_0 : i32, i32
  }
  func.func @transform_6(%arg0: i32) -> (i32, i32) {
    %c0_i32 = arith.constant 0 : i32
    %c0_i32_0 = arith.constant 0 : i32
    return %arg0, %c0_i32 : i32, i32
  }
  func.func @transform_7(%arg0: i32) -> (i32, i32) {
    %c0_i32 = arith.constant 0 : i32
    %c0_i32_0 = arith.constant 0 : i32
    return %arg0, %c0_i32 : i32, i32
  }
}

</mosaic_0001>

<bundles_post_ra>
// kernel: tpu_custom_call.1
= control target key start
LH: loop header
LB: loop body
LE: loop exit
PB: predicated region body
PF: predicated region fallthrough
CT: control target
= control target key end

     0   :  { %13 = vsyncpa [#allocation3], 0  ;;  %s490_s0 = inlined_call_operand.vmem [shape: f32[64,32], index: 0, kind: input, shape index: {}]   ;;  %s491_s1 = inlined_call_operand.vmem [shape: f32[32,32], index: 1, kind: input, shape index: {}]   ;;  %s492_s2 = inlined_call_operand.vmem [shape: f32[1,32], index: 2, kind: input, shape index: {}]   ;;  %s493_s3 = inlined_call_operand.vmem [shape: f32[32,128], index: 3, kind: input, shape index: {}]   ;;  %s494_s4 = inlined_call_operand.vmem [shape: f32[1,128], index: 4, kind: input, shape index: {}]   ;;  %s495_s5 = inlined_call_operand.vmem [shape: f32[8,64], index: 5, kind: input, shape index: {}]   ;;  %s496_s6 = inlined_call_operand.hbm [shape: f32[64,128], index: 6, kind: output, shape index: {0}]   ;;  %s497_s7 = inlined_call_operand.hbm [shape: f32[8,128], index: 7, kind: output, shape index: {1}]  }
   0x1   :  { %v38_v0 = vld [vmem:[%s491_s1 + $0x18] sm:$0xff]  ;;  %v37_v1 = vld [vmem:[%s491_s1 + $0x10] sm:$0xff]  ;;  %v36_v2 = vld [vmem:[%s491_s1 + $0x8] sm:$0xff] }
   0x2   :  { %80 = vmatpush.msra.mxu0 %v38_v0  ;;  %300 = vmatpush.msra.mxu3 %v38_v0  ;;  %v35_v3 = vld [vmem:[%s491_s1] sm:$0xff] }
   0x4   :  { %81 = vmatpush.msra.mxu0 %v37_v1  ;;  %301 = vmatpush.msra.mxu3 %v37_v1 }
   0x5   :  { %14 = vsyncpa [#allocation5], 0  ;;  %v27_v4 = vld [vmem:[%s490_s0] sm:$0xff]  ;;  %vm43_vm0 = vcmask 261120   ;;  %v32_v5 = vld [vmem:[%s490_s0 + $0x28] sm:$0xff]  ;;  %vm199_vm1 = vcmask 523264  }
   0x6   :  { %82 = vmatpush.msra.mxu0 %v36_v2  ;;  %302 = vmatpush.msra.mxu3 %v36_v2  ;;  %v120_v6 = vld [vmem:[%s493_s3 + $0x18] sm:$0xff]  ;;  %v28_v7 = vld [vmem:[%s490_s0 + $0x8] sm:$0xff]  ;;  %v33_v8 = vld [vmem:[%s490_s0 + $0x30] sm:$0xff]  ;;  %s254_s1 = sshll.u32 %s496_s6, 4  ;;  %s367_s14 = smov 128   ;;  %s255_s1 = int_to_ptr.hbm [resolvable:$true] %s254_s1 }
   0x7   :  { %161 = vmatpush.msra.mxu1 %v120_v6  ;;  %304 = vmatpush.msra.mxu2 %v120_v6  ;;  %v29_v9 = vld [vmem:[%s490_s0 + $0x10] sm:$0xff]  ;;  %v34_v10 = vld [vmem:[%s490_s0 + $0x38] sm:$0xff]  ;;  %v31_v12 = vld [vmem:[%s490_s0 + $0x20] sm:$0xff]  ;;  %s368_s15 = smov 8   ;;  %s369_s16 = smov [#allocation4]  }
   0x8   :  { %83 = vmatpush.msra.mxu0 %v35_v3  ;;  %303 = vmatpush.msra.mxu3 %v35_v3  ;;  %v30_v11 = vld [vmem:[%s490_s0 + $0x18] sm:$0xff]  ;;  %v119_v13 = vld [vmem:[%s493_s3 + $0x10] sm:$0xff]  ;;  %v118_v14 = vld [vmem:[%s493_s3 + $0x8] sm:$0xff]  ;;  %s266_s17 = sshll.u32 %s369_s16, 4  ;;  %s268_s20 = sshll.u32 %s497_s7, 4  ;;  %s267_s17 = int_to_ptr.vmem [resolvable:$true] %s266_s17  ;;  %s269_s20 = int_to_ptr.hbm [resolvable:$true] %s268_s20 }
   0x9   :  { %282 = vmatmul.msk.f32.vlgmr.msra.gmra.mxu0 %vm43_vm0, %v27_v4  ;;  %287 = vmatmul.msk.f32.vlgmr.msra.gmra.mxu3 %vm43_vm0, %v32_v5  ;;  %v117_v15 = vld [vmem:[%s493_s3] sm:$0xff] }
   0xa   :  { %239 = vmatpush.msrb.mxu3 %v120_v6  ;;  %162 = vmatpush.msra.mxu1 %v119_v13  ;;  %v312_v16 = vld [vmem:[%s492_s2] ss:$0 sm:$0xff] }
   0xb   :  { %305 = vmatpush.msra.mxu2 %v119_v13  ;;  %v198_v41 = vld [vmem:[%s495_s5] sm:$0xff] }
   0xc   :  { %240 = vmatpush.msrb.mxu3 %v119_v13  ;;  %163 = vmatpush.msra.mxu1 %v118_v14  ;;  %v313_v42 = vld [vmem:[%s494_s4] ss:$0 sm:$0xff]  ;;  %s366_s4 = smov [#allocation2]  }
   0xd   :  { %306 = vmatpush.msra.mxu2 %v118_v14  ;;  %s252_s5 = sshll.u32 %s366_s4, 4  ;;  %s253_s5 = int_to_ptr.vmem [resolvable:$true] %s252_s5 }
   0xe   :  { %241 = vmatpush.msrb.mxu3 %v118_v14  ;;  %164 = vmatpush.msra.mxu1 %v117_v15 }
   0xf   :  { %307 = vmatpush.msra.mxu2 %v117_v15 }
  0x10   :  { %242 = vmatpush.msrb.mxu3 %v117_v15 }
  0x11   :  { %283 = vmatmul.msk.f32.gmra.mxu0 %vm43_vm0, %v28_v7  ;;  %288 = vmatmul.msk.f32.gmra.mxu3 %vm43_vm0, %v33_v8 }
  0x19   :  { %284 = vmatmul.msk.f32.gmra.mxu0 %vm43_vm0, %v29_v9  ;;  %289 = vmatmul.msk.f32.gmra.mxu3 %vm43_vm0, %v34_v10 }
  0x21   :  { %285 = vmatmul.msk.f32.gmra.mxu0 %vm43_vm0, %v30_v11 }
  0x29   :  { %286 = vmatmul.msk.f32.gmra.mxu0 %vm43_vm0, %v31_v12 }
  0x86   :  { %v85_v17 = vpop.f32.mrf.mxu0 }
  0x87   :  { %v86_v18 = vadd.f32 %v312_v16, %v85_v17 }
  0x89   :  { %v109_v19 = vmax.f32 %v86_v18, 0.0 }
  0x8b   :  { %290 = vmatmul.msk.f32.vlgmr.msra.gmra.mxu1 %vm43_vm0, %v109_v19 }
  0x8c   :  { %v100_v20 = vpop.f32.mrf.mxu3 }
  0x8d   :  { %v101_v21 = vadd.f32 %v312_v16, %v100_v20 }
  0x8e   :  { %v88_v22 = vpop.f32.mrf.mxu0 }
  0x8f   :  { %v114_v23 = vmax.f32 %v101_v21, 0.0  ;;  %v89_v24 = vadd.f32 %v312_v16, %v88_v22 }
  0x91   :  { %v110_v25 = vmax.f32 %v89_v24, 0.0  ;;  %295 = vmatmul.msk.f32.vlgmr.msra.gmra.mxu2 %vm43_vm0, %v114_v23 }
  0x93   :  { %291 = vmatmul.msk.f32.gmra.mxu1 %vm43_vm0, %v110_v25 }
  0x94   :  { %v103_v26 = vpop.f32.mrf.mxu3 }
  0x95   :  { %v104_v27 = vadd.f32 %v312_v16, %v103_v26 }
  0x96   :  { %v91_v28 = vpop.f32.mrf.mxu0 }
  0x97   :  { %v115_v29 = vmax.f32 %v104_v27, 0.0  ;;  %v92_v30 = vadd.f32 %v312_v16, %v91_v28 }
  0x99   :  { %v111_v31 = vmax.f32 %v92_v30, 0.0  ;;  %296 = vmatmul.msk.f32.gmra.mxu2 %vm43_vm0, %v115_v29 }
  0x9b   :  { %292 = vmatmul.msk.f32.gmra.mxu1 %vm43_vm0, %v111_v31 }
  0x9c   :  { %v106_v32 = vpop.f32.mrf.mxu3 }
  0x9d   :  { %v107_v33 = vadd.f32 %v312_v16, %v106_v32 }
  0x9e   :  { %v94_v34 = vpop.f32.mrf.mxu0 }
  0x9f   :  { %v116_v35 = vmax.f32 %v107_v33, 0.0  ;;  %v95_v36 = vadd.f32 %v312_v16, %v94_v34 }
  0xa1   :  { %v112_v37 = vmax.f32 %v95_v36, 0.0  ;;  %211 = vmatpush.msrb.mxu2 %v116_v35 }
  0xa2   :  { %297 = vmatmul.msk.f32.gmra.mxu2 %vm43_vm0, %v116_v35 }
  0xa3   :  { %293 = vmatmul.msk.f32.gmra.mxu1 %vm43_vm0, %v112_v37  ;;  %212 = vmatpush.msrb.mxu2 %v115_v29 }
  0xa5   :  { %213 = vmatpush.msrb.mxu2 %v114_v23 }
  0xa6   :  { %v97_v38 = vpop.f32.mrf.mxu0 }
  0xa7   :  { %v98_v39 = vadd.f32 %v312_v16, %v97_v38 }
  0xa9   :  { %v113_v40 = vmax.f32 %v98_v39, 0.0 }
  0xab   :  { %294 = vmatmul.msk.f32.gmra.mxu1 %vm43_vm0, %v113_v40  ;;  %214 = vmatpush.msrb.mxu2 %v113_v40 }
  0xad   :  { %215 = vmatpush.msrb.mxu2 %v112_v37 }
  0xaf   :  { %216 = vmatpush.msrb.mxu2 %v111_v31 }
  0xb1   :  { %217 = vmatpush.msrb.mxu2 %v110_v25 }
  0xb3   :  { %218 = vmatpush.msrb.mxu2 %v109_v19 }
  0xb4   :  { %298 = vmatmul.msk.f32.vlgmr.msrb.gmra.mxu2 %vm199_vm1, %v198_v41 }
 0x108   :  { %v166_v43 = vpop.f32.mrf.mxu1 }
 0x109   :  { %v167_v44 = vadd.f32 %v313_v42, %v166_v43 }
 0x10b   :  { %190 = vst [vmem:[#allocation2] sm:$0xff] %v167_v44 }
 0x110   :  { %v169_v45 = vpop.f32.mrf.mxu1 }
 0x111   :  { %v170_v46 = vadd.f32 %v313_v42, %v169_v45 }
 0x113   :  { %191 = vst [vmem:[#allocation2 + $0x8] sm:$0xff] %v170_v46 }
 0x114   :  { %v181_v47 = vpop.f32.mrf.mxu2 }
 0x115   :  { %v182_v48 = vadd.f32 %v313_v42, %v181_v47 }
 0x117   :  { %195 = vst [vmem:[#allocation2 + $0x28] sm:$0xff] %v182_v48 }
 0x118   :  { %v172_v49 = vpop.f32.mrf.mxu1 }
 0x119   :  { %v173_v50 = vadd.f32 %v313_v42, %v172_v49 }
 0x11b   :  { %192 = vst [vmem:[#allocation2 + $0x10] sm:$0xff] %v173_v50 }
 0x11c   :  { %v184_v51 = vpop.f32.mrf.mxu2 }
 0x11d   :  { %v185_v52 = vadd.f32 %v313_v42, %v184_v51 }
 0x11f   :  { %196 = vst [vmem:[#allocation2 + $0x30] sm:$0xff] %v185_v52 }
 0x120   :  { %v175_v53 = vpop.f32.mrf.mxu1 }
 0x121   :  { %v176_v54 = vadd.f32 %v313_v42, %v175_v53 }
 0x123   :  { %193 = vst [vmem:[#allocation2 + $0x18] sm:$0xff] %v176_v54 }
 0x125   :  { %v187_v55 = vpop.f32.mrf.mxu2 }
 0x126   :  { %v188_v56 = vadd.f32 %v313_v42, %v187_v55 }
 0x128   :  { %197 = vst [vmem:[#allocation2 + $0x38] sm:$0xff] %v188_v56  ;;  %v178_v57 = vpop.f32.mrf.mxu1 }
 0x129   :  { %v179_v58 = vadd.f32 %v313_v42, %v178_v57 }
 0x12b   :  { %194 = vst [vmem:[#allocation2 + $0x20] sm:$0xff] %v179_v58 }
 0x12c   :  { %260 = dma.vmem_to_hbm [thread:$0]  %s253_s5, 1024, %s255_s1, [#allocation3], %s367_s14, %s367_s14, %s368_s15  }
 0x137   :  { %v220_v59 = vpop.f32.mrf.mxu2 }
 0x138   :  { %v223_v60 = vmul.f32 0.125, %v220_v59 }
 0x13a   :  { %299 = vmatmul.msk.f32.vlgmr.msrb.gmra.mxu3 %vm43_vm0, %v223_v60 }
 0x1bd   :  { %v244_v61 = vpop.f32.mrf.mxu3 }
 0x1be   :  { %v245_v62 = vadd.f32 %v313_v42, %v244_v61 }
 0x1c0   :  { %247 = vst [vmem:[#allocation4] sm:$0xff] %v245_v62 }
 0x1c1   :  { %271 = dma.vmem_to_hbm [thread:$0]  %s267_s17, 128, %s269_s20, [#allocation5]  }
 0x1c2   :  { %362 = dma.done.wait [#allocation3], 1024  }
 0x1c3   :  { %363 = vsyncadd [#allocation3], 4294966272 }
 0x1c4   :  { %364 = dma.done.wait [#allocation5], 128  }
 0x1c5   :  { %365 = vsyncadd [#allocation5], 4294967168 }
 0x1c6   :  { %280 = vsyncpa [#allocation3], 1 }
 0x1c7   :  { %281 = vsyncpa [#allocation5], 1 }

// kernel: tpu_custom_call.1
= control target key start
LH: loop header
LB: loop body
LE: loop exit
PB: predicated region body
PF: predicated region fallthrough
CT: control target
= control target key end

     0   :  { %13 = vsyncpa [#allocation3], 0  ;;  %s490_s0 = inlined_call_operand.vmem [shape: f32[64,32], index: 0, kind: input, shape index: {}]   ;;  %s491_s1 = inlined_call_operand.vmem [shape: f32[32,32], index: 1, kind: input, shape index: {}]   ;;  %s492_s2 = inlined_call_operand.vmem [shape: f32[1,32], index: 2, kind: input, shape index: {}]   ;;  %s493_s3 = inlined_call_operand.vmem [shape: f32[32,128], index: 3, kind: input, shape index: {}]   ;;  %s494_s4 = inlined_call_operand.vmem [shape: f32[1,128], index: 4, kind: input, shape index: {}]   ;;  %s495_s5 = inlined_call_operand.vmem [shape: f32[8,64], index: 5, kind: input, shape index: {}]   ;;  %s496_s6 = inlined_call_operand.hbm [shape: f32[64,128], index: 6, kind: output, shape index: {0}]   ;;  %s497_s7 = inlined_call_operand.hbm [shape: f32[8,128], index: 7, kind: output, shape index: {1}]  }
   0x1   :  { %v38_v0 = vld [vmem:[%s491_s1 + $0x18] sm:$0xff]  ;;  %v37_v1 = vld [vmem:[%s491_s1 + $0x10] sm:$0xff]  ;;  %v36_v2 = vld [vmem:[%s491_s1 + $0x8] sm:$0xff] }
   0x2   :  { %80 = vmatpush.msra.mxu0 %v38_v0  ;;  %300 = vmatpush.msra.mxu3 %v38_v0  ;;  %v35_v3 = vld [vmem:[%s491_s1] sm:$0xff] }
   0x4   :  { %81 = vmatpush.msra.mxu0 %v37_v1  ;;  %301 = vmatpush.msra.mxu3 %v37_v1 }
   0x5   :  { %14 = vsyncpa [#allocation5], 0  ;;  %v27_v4 = vld [vmem:[%s490_s0] sm:$0xff]  ;;  %vm43_vm0 = vcmask 261120   ;;  %v32_v5 = vld [vmem:[%s490_s0 + $0x28] sm:$0xff]  ;;  %vm199_vm1 = vcmask 523264  }
   0x6   :  { %82 = vmatpush.msra.mxu0 %v36_v2  ;;  %302 = vmatpush.msra.mxu3 %v36_v2  ;;  %v120_v6 = vld [vmem:[%s493_s3 + $0x18] sm:$0xff]  ;;  %v28_v7 = vld [vmem:[%s490_s0 + $0x8] sm:$0xff]  ;;  %v33_v8 = vld [vmem:[%s490_s0 + $0x30] sm:$0xff]  ;;  %s254_s1 = sshll.u32 %s496_s6, 4  ;;  %s367_s14 = smov 128   ;;  %s255_s1 = int_to_ptr.hbm [resolvable:$true] %s254_s1 }
   0x7   :  { %161 = vmatpush.msra.mxu1 %v120_v6  ;;  %304 = vmatpush.msra.mxu2 %v120_v6  ;;  %v29_v9 = vld [vmem:[%s490_s0 + $0x10] sm:$0xff]  ;;  %v34_v10 = vld [vmem:[%s490_s0 + $0x38] sm:$0xff]  ;;  %v31_v12 = vld [vmem:[%s490_s0 + $0x20] sm:$0xff]  ;;  %s368_s15 = smov 8   ;;  %s369_s16 = smov [#allocation4]  }
   0x8   :  { %83 = vmatpush.msra.mxu0 %v35_v3  ;;  %303 = vmatpush.msra.mxu3 %v35_v3  ;;  %v30_v11 = vld [vmem:[%s490_s0 + $0x18] sm:$0xff]  ;;  %v119_v13 = vld [vmem:[%s493_s3 + $0x10] sm:$0xff]  ;;  %v118_v14 = vld [vmem:[%s493_s3 + $0x8] sm:$0xff]  ;;  %s266_s17 = sshll.u32 %s369_s16, 4  ;;  %s268_s20 = sshll.u32 %s497_s7, 4  ;;  %s267_s17 = int_to_ptr.vmem [resolvable:$true] %s266_s17  ;;  %s269_s20 = int_to_ptr.hbm [resolvable:$true] %s268_s20 }
   0x9   :  { %282 = vmatmul.msk.f32.vlgmr.msra.gmra.mxu0 %vm43_vm0, %v27_v4  ;;  %287 = vmatmul.msk.f32.vlgmr.msra.gmra.mxu3 %vm43_vm0, %v32_v5  ;;  %v117_v15 = vld [vmem:[%s493_s3] sm:$0xff] }
   0xa   :  { %239 = vmatpush.msrb.mxu3 %v120_v6  ;;  %162 = vmatpush.msra.mxu1 %v119_v13  ;;  %v312_v16 = vld [vmem:[%s492_s2] ss:$0 sm:$0xff] }
   0xb   :  { %305 = vmatpush.msra.mxu2 %v119_v13  ;;  %v198_v41 = vld [vmem:[%s495_s5] sm:$0xff] }
   0xc   :  { %240 = vmatpush.msrb.mxu3 %v119_v13  ;;  %163 = vmatpush.msra.mxu1 %v118_v14  ;;  %v313_v42 = vld [vmem:[%s494_s4] ss:$0 sm:$0xff]  ;;  %s366_s4 = smov [#allocation2]  }
   0xd   :  { %306 = vmatpush.msra.mxu2 %v118_v14  ;;  %s252_s5 = sshll.u32 %s366_s4, 4  ;;  %s253_s5 = int_to_ptr.vmem [resolvable:$true] %s252_s5 }
   0xe   :  { %241 = vmatpush.msrb.mxu3 %v118_v14  ;;  %164 = vmatpush.msra.mxu1 %v117_v15 }
   0xf   :  { %307 = vmatpush.msra.mxu2 %v117_v15 }
  0x10   :  { %242 = vmatpush.msrb.mxu3 %v117_v15 }
  0x11   :  { %283 = vmatmul.msk.f32.gmra.mxu0 %vm43_vm0, %v28_v7  ;;  %288 = vmatmul.msk.f32.gmra.mxu3 %vm43_vm0, %v33_v8 }
  0x19   :  { %284 = vmatmul.msk.f32.gmra.mxu0 %vm43_vm0, %v29_v9  ;;  %289 = vmatmul.msk.f32.gmra.mxu3 %vm43_vm0, %v34_v10 }
  0x21   :  { %285 = vmatmul.msk.f32.gmra.mxu0 %vm43_vm0, %v30_v11 }
  0x29   :  { %286 = vmatmul.msk.f32.gmra.mxu0 %vm43_vm0, %v31_v12 }
  0x86   :  { %v85_v17 = vpop.f32.mrf.mxu0 }
  0x87   :  { %v86_v18 = vadd.f32 %v312_v16, %v85_v17 }
  0x89   :  { %v109_v19 = vmax.f32 %v86_v18, 0.0 }
  0x8b   :  { %290 = vmatmul.msk.f32.vlgmr.msra.gmra.mxu1 %vm43_vm0, %v109_v19 }
  0x8c   :  { %v100_v20 = vpop.f32.mrf.mxu3 }
  0x8d   :  { %v101_v21 = vadd.f32 %v312_v16, %v100_v20 }
  0x8e   :  { %v88_v22 = vpop.f32.mrf.mxu0 }
  0x8f   :  { %v114_v23 = vmax.f32 %v101_v21, 0.0  ;;  %v89_v24 = vadd.f32 %v312_v16, %v88_v22 }
  0x91   :  { %v110_v25 = vmax.f32 %v89_v24, 0.0  ;;  %295 = vmatmul.msk.f32.vlgmr.msra.gmra.mxu2 %vm43_vm0, %v114_v23 }
  0x93   :  { %291 = vmatmul.msk.f32.gmra.mxu1 %vm43_vm0, %v110_v25 }
  0x94   :  { %v103_v26 = vpop.f32.mrf.mxu3 }
  0x95   :  { %v104_v27 = vadd.f32 %v312_v16, %v103_v26 }
  0x96   :  { %v91_v28 = vpop.f32.mrf.mxu0 }
  0x97   :  { %v115_v29 = vmax.f32 %v104_v27, 0.0  ;;  %v92_v30 = vadd.f32 %v312_v16, %v91_v28 }
  0x99   :  { %v111_v31 = vmax.f32 %v92_v30, 0.0  ;;  %296 = vmatmul.msk.f32.gmra.mxu2 %vm43_vm0, %v115_v29 }
  0x9b   :  { %292 = vmatmul.msk.f32.gmra.mxu1 %vm43_vm0, %v111_v31 }
  0x9c   :  { %v106_v32 = vpop.f32.mrf.mxu3 }
  0x9d   :  { %v107_v33 = vadd.f32 %v312_v16, %v106_v32 }
  0x9e   :  { %v94_v34 = vpop.f32.mrf.mxu0 }
  0x9f   :  { %v116_v35 = vmax.f32 %v107_v33, 0.0  ;;  %v95_v36 = vadd.f32 %v312_v16, %v94_v34 }
  0xa1   :  { %v112_v37 = vmax.f32 %v95_v36, 0.0  ;;  %211 = vmatpush.msrb.mxu2 %v116_v35 }
  0xa2   :  { %297 = vmatmul.msk.f32.gmra.mxu2 %vm43_vm0, %v116_v35 }
  0xa3   :  { %293 = vmatmul.msk.f32.gmra.mxu1 %vm43_vm0, %v112_v37  ;;  %212 = vmatpush.msrb.mxu2 %v115_v29 }
  0xa5   :  { %213 = vmatpush.msrb.mxu2 %v114_v23 }
  0xa6   :  { %v97_v38 = vpop.f32.mrf.mxu0 }
  0xa7   :  { %v98_v39 = vadd.f32 %v312_v16, %v97_v38 }
  0xa9   :  { %v113_v40 = vmax.f32 %v98_v39, 0.0 }
  0xab   :  { %294 = vmatmul.msk.f32.gmra.mxu1 %vm43_vm0, %v113_v40  ;;  %214 = vmatpush.msrb.mxu2 %v113_v40 }
  0xad   :  { %215 = vmatpush.msrb.mxu2 %v112_v37 }
  0xaf   :  { %216 = vmatpush.msrb.mxu2 %v111_v31 }
  0xb1   :  { %217 = vmatpush.msrb.mxu2 %v110_v25 }
  0xb3   :  { %218 = vmatpush.msrb.mxu2 %v109_v19 }
  0xb4   :  { %298 = vmatmul.msk.f32.vlgmr.msrb.gmra.mxu2 %vm199_vm1, %v198_v41 }
 0x108   :  { %v166_v43 = vpop.f32.mrf.mxu1 }
 0x109   :  { %v167_v44 = vadd.f32 %v313_v42, %v166_v43 }
 0x10b   :  { %190 = vst [vmem:[#allocation2] sm:$0xff] %v167_v44 }
 0x110   :  { %v169_v45 = vpop.f32.mrf.mxu1 }
 0x111   :  { %v170_v46 = vadd.f32 %v313_v42, %v169_v45 }
 0x113   :  { %191 = vst [vmem:[#allocation2 + $0x8] sm:$0xff] %v170_v46 }
 0x114   :  { %v181_v47 = vpop.f32.mrf.mxu2 }
 0x115   :  { %v182_v48 = vadd.f32 %v313_v42, %v181_v47 }
 0x117   :  { %195 = vst [vmem:[#allocation2 + $0x28] sm:$0xff] %v182_v48 }
 0x118   :  { %v172_v49 = vpop.f32.mrf.mxu1 }
 0x119   :  { %v173_v50 = vadd.f32 %v313_v42, %v172_v49 }
 0x11b   :  { %192 = vst [vmem:[#allocation2 + $0x10] sm:$0xff] %v173_v50 }
 0x11c   :  { %v184_v51 = vpop.f32.mrf.mxu2 }
 0x11d   :  { %v185_v52 = vadd.f32 %v313_v42, %v184_v51 }
 0x11f   :  { %196 = vst [vmem:[#allocation2 + $0x30] sm:$0xff] %v185_v52 }
 0x120   :  { %v175_v53 = vpop.f32.mrf.mxu1 }
 0x121   :  { %v176_v54 = vadd.f32 %v313_v42, %v175_v53 }
 0x123   :  { %193 = vst [vmem:[#allocation2 + $0x18] sm:$0xff] %v176_v54 }
 0x125   :  { %v187_v55 = vpop.f32.mrf.mxu2 }
 0x126   :  { %v188_v56 = vadd.f32 %v313_v42, %v187_v55 }
 0x128   :  { %197 = vst [vmem:[#allocation2 + $0x38] sm:$0xff] %v188_v56  ;;  %v178_v57 = vpop.f32.mrf.mxu1 }
 0x129   :  { %v179_v58 = vadd.f32 %v313_v42, %v178_v57 }
 0x12b   :  { %194 = vst [vmem:[#allocation2 + $0x20] sm:$0xff] %v179_v58 }
 0x12c   :  { %260 = dma.vmem_to_hbm [thread:$0]  %s253_s5, 1024, %s255_s1, [#allocation3], %s367_s14, %s367_s14, %s368_s15  }
 0x137   :  { %v220_v59 = vpop.f32.mrf.mxu2 }
 0x138   :  { %v223_v60 = vmul.f32 0.125, %v220_v59 }
 0x13a   :  { %299 = vmatmul.msk.f32.vlgmr.msrb.gmra.mxu3 %vm43_vm0, %v223_v60 }
 0x1bd   :  { %v244_v61 = vpop.f32.mrf.mxu3 }
 0x1be   :  { %v245_v62 = vadd.f32 %v313_v42, %v244_v61 }
 0x1c0   :  { %247 = vst [vmem:[#allocation4] sm:$0xff] %v245_v62 }
 0x1c1   :  { %271 = dma.vmem_to_hbm [thread:$0]  %s267_s17, 128, %s269_s20, [#allocation5]  }
 0x1c2   :  { %362 = dma.done.wait [#allocation3], 1024  }
 0x1c3   :  { %363 = vsyncadd [#allocation3], 4294966272 }
 0x1c4   :  { %364 = dma.done.wait [#allocation5], 128  }
 0x1c5   :  { %365 = vsyncadd [#allocation5], 4294967168 }
 0x1c6   :  { %280 = vsyncpa [#allocation3], 1 }
 0x1c7   :  { %281 = vsyncpa [#allocation5], 1 }

</bundles_post_ra>
